<compile_context>
chip_gen: v5e
topology: v5e:2x2
jax: 0.10.0
libtpu: 0.0.40
codegen_flags: <defaults>
</compile_context>

<pallas_src>
import jax
import jax.numpy as jnp
from jax.experimental import pallas as pl
from jax.experimental.pallas import tpu as pltpu


def _leaky(v, slope=0.4):
    # F.leaky_relu(v, 0.4)
    return jnp.where(v >= 0, v, slope * v)


def _round_up(a, b):
    return (a + b - 1) // b * b


# ---------------------------------------------------------------------------
# Kernel: one tile of TN rows (rows on the lane axis).  All conv activations
# live in a channel-major (c, w) flattened layout of C*D = 128 sublanes.
# ---------------------------------------------------------------------------
def denoise_wrapper_kernel(
    p_ref,      # (K=D+C+L, TN)  packed rows: [x+emb ; step-emb ; latent] (compute dtype)
    win_ref,    # (C*D, K)   input Conv1d(1,C,1) expansion (zero outside x+emb rows)
    wc_ref,     # (C*D, K)   cond upsampler Linear(L->D), widened (zero outside lat rows)
    s_ref,      # (C*D, K)   step-embedding channel expansion (zero outside step rows)
    wmid_ref,   # (C*D, C*D) mid Conv1d(C,C,3,pad=1) banded dense, transposed
    wout_ref,   # (D, C*D)   out Conv1d(C,1,3,pad=1) banded dense, transposed
    cols_ref,   # (C*D, 4) f32 columns: [b_in, b_cond, w_cp, b_mid (+b_cp folded)]
    bout_ref,   # (1, 1) f32 scalar in SMEM
    o_ref,      # (D, TN) f32
):
    f32 = jnp.float32
    p = p_ref[...]                                     # (K, TN)
    cols = cols_ref[...]                               # (C*D, 4) f32
    b_in = cols[:, 0:1]
    b_c = cols[:, 1:2]
    w_cp = cols[:, 2:3]
    b_mid = cols[:, 3:4]

    # Pre-activation branches: three small MXU matmuls over the packed slab
    # (replaces the former concat-of-copies / broadcast_to lane expansions).
    pre_in = jnp.dot(win_ref[...], p, preferred_element_type=f32) + b_in    # (C*D, TN)
    pre_cond = jnp.dot(wc_ref[...], p, preferred_element_type=f32) + b_c    # (C*D, TN)
    pre_step = jnp.dot(s_ref[...], p, preferred_element_type=f32)           # (C*D, TN)
    h = _leaky(pre_in) + w_cp * _leaky(pre_cond) + pre_step                 # f32

    # mid Conv1d(C, C, 3, pad=1): one lane-dense (C*D,C*D) @ (C*D,TN) MXU matmul
    mid = _leaky(
        jnp.dot(wmid_ref[...], h.astype(wmid_ref.dtype),
                preferred_element_type=f32) + b_mid)                        # (C*D, TN)

    # out Conv1d(C, 1, 3, pad=1): (D, C*D) @ (C*D, TN) -> lane-dense (D, TN) store
    o_ref[...] = (
        jnp.dot(wout_ref[...], mid.astype(wout_ref.dtype),
                preferred_element_type=f32) + bout_ref[0, 0]
    ).astype(o_ref.dtype)


# ---------------------------------------------------------------------------
# Host-side exact reparametrization of the conv weights into the transposed
# wide layout.  Flat feature index j = c * D + w (channel-major, width minor).
# ---------------------------------------------------------------------------
def _prepare_weights(params, D, C, L, compute_dtype):
    f32 = jnp.float32
    CD = C * D
    as32 = lambda k: params[k].astype(f32)
    w_in, b_in = as32("w_in"), as32("b_in")          # (1, C)
    wc, bc = as32("wc"), as32("bc")                  # (L, D), (1, D)
    w_cp, b_cp = as32("w_cp"), as32("b_cp")          # (1, C)
    w_mid, b_mid = as32("w_mid"), as32("b_mid")      # (3, C, C), (1, C)
    w_out, b_out = as32("w_out"), as32("b_out")      # (3, C, 1), (1, 1)

    rep = lambda a: jnp.repeat(a, D, axis=1)         # per-channel (1,C) -> per-(c,w)
    til = lambda a: jnp.tile(a, (1, C))              # per-width (1,D)   -> per-(c,w)

    # width-shift matrices: S_k[w_in, w_out] = 1 iff w_in == w_out + k - 1 (zero padding)
    shifts = [jnp.eye(D, k=-(kk - 1), dtype=f32) for kk in range(3)]
    big_mid = sum(jnp.kron(w_mid[kk], shifts[kk]) for kk in range(3))   # (C*D, C*D)
    big_out = sum(jnp.kron(w_out[kk], shifts[kk]) for kk in range(3))   # (C*D, D)

    # pre-activation expansion matrices, zero-extended over the packed K = D+C+L rows
    # so the kernel never slices the packed slab (row order: [x+emb ; step ; lat]).
    win_exp = jnp.kron(w_in.reshape(C, 1), jnp.eye(D, dtype=f32))       # (C*D, D)
    s_exp = jnp.kron(jnp.eye(C, dtype=f32), jnp.ones((D, 1), f32))      # (C*D, C)
    wc_exp = jnp.tile(wc.T, (C, 1))                                     # (C*D, L)
    z = lambda n: jnp.zeros((CD, n), f32)
    win_k = jnp.concatenate([win_exp, z(C), z(L)], axis=1)              # (C*D, D+C+L)
    s_k = jnp.concatenate([z(D), s_exp, z(L)], axis=1)                  # (C*D, D+C+L)
    wc_k = jnp.concatenate([z(D), z(C), wc_exp], axis=1)                # (C*D, D+C+L)

    # bias / scale columns (kept f32); b_cp folded exactly into the mid-conv bias:
    #   (h' + b_cp_wide) @ W_mid + b_mid_wide == h' @ W_mid + (b_cp_wide @ W_mid + b_mid_wide)
    b_mid_eff = (rep(b_cp) @ big_mid + rep(b_mid)).T                    # (C*D, 1)
    cols = jnp.concatenate(
        [rep(b_in).T, til(bc).T, rep(w_cp).T, b_mid_eff], axis=1)       # (C*D, 4)

    cd = compute_dtype
    return dict(win=win_k.astype(cd), wc=wc_k.astype(cd), s=s_k.astype(cd),
                wmid=big_mid.T.astype(cd), wout=big_out.T.astype(cd),
                cols=cols, bout=b_out)


def denoise_wrapper_forward(params, x, t, i, latent, *, tile_n=1024,
                            compute_dtype=jnp.bfloat16):
    """Pallas implementation of DenoiseWrapper.forward (time_input=True)."""
    f32 = jnp.float32
    B, T, D = x.shape
    N = B * T
    L = latent.shape[-1]
    C = params["w_in"].shape[1]
    K = D + C + L

    # --- DiffusionEmbedding folded host-side: static table -> Linear+SiLU -> Linear+SiLU ---
    proj = jax.nn.silu(params["time_table"].astype(f32) @ params["w1"] + params["b1"])
    proj = jax.nn.silu(proj @ params["w2"] + params["b2"])              # (max_steps, D)

    # --- glue (as in the PyTorch wrapper) + host pre-add of the time embedding ---
    t_flat = t.reshape(-1).astype(jnp.int32)                  # t.squeeze(-1).long()
    i_flat = i.reshape(-1).astype(jnp.int32)                  # i.view(-1).long()
    xe = x.reshape(N, D).astype(f32) + proj[t_flat]           # x + time_embedding(t)
    step_rows = params["step_table"][i_flat].astype(f32)      # denoise_fn step emb (N, C)
    lat2 = latent.reshape(N, L).astype(f32)                   # latent.reshape(-1, 1, L)

    # --- one feature-major packed slab: rows = [x+emb ; step ; lat], lanes = data rows ---
    packed_t = jnp.concatenate(
        [xe.T, step_rows.T, lat2.T], axis=0).astype(compute_dtype)      # (K, N)

    w = _prepare_weights(params, D, C, L, compute_dtype)

    # --- tile rows along the lane axis; keep >=2 tiles when N allows (v7x megacore) ---
    want = max(128, (int(tile_n) // 128) * 128)
    half = _round_up(max(1, (N + 1) // 2), 128)
    tn = min(want, half)
    n_pad = _round_up(N, tn)
    if n_pad != N:
        packed_t = jnp.pad(packed_t, ((0, 0), (0, n_pad - N)))

    full = lambda a: pl.BlockSpec(a.shape, lambda g: (0, 0))

    y_t = pl.pallas_call(
        denoise_wrapper_kernel,
        out_shape=jax.ShapeDtypeStruct((D, n_pad), f32),
        grid_spec=pltpu.PrefetchScalarGridSpec(
            num_scalar_prefetch=0,
            grid=(n_pad // tn,),
            in_specs=[
                pl.BlockSpec((K, tn), lambda g: (0, g)),               # packed rows
                full(w["win"]), full(w["wc"]), full(w["s"]),
                full(w["wmid"]), full(w["wout"]), full(w["cols"]),
                pl.BlockSpec(memory_space=pltpu.MemorySpace.SMEM),     # b_out scalar
            ],
            out_specs=pl.BlockSpec((D, tn), lambda g: (0, g)),         # lane-dense store
        ),
        compiler_params=pltpu.CompilerParams(
            dimension_semantics=("parallel",),     # megacore split on v7x
        ),
    )(packed_t, w["win"], w["wc"], w["s"], w["wmid"], w["wout"], w["cols"], w["bout"])

    return y_t[:, :N].T.reshape(B, T, D)                               # y.view(*shape)


def reference_forward(params, x, t, i, latent):
    """Plain-JAX reference with the original (un-folded) semantics."""
    B, T, D = x.shape
    N = B * T
    L = latent.shape[-1]
    C = params["w_in"].shape[1]
    t_flat = t.reshape(-1).astype(jnp.int32)
    i_flat = i.reshape(-1).astype(jnp.int32)

    e = params["time_table"][t_flat]
    e = jax.nn.silu(e @ params["w1"] + params["b1"])
    e = jax.nn.silu(e @ params["w2"] + params["b2"])
    x2 = x.reshape(N, D) + e

    cond = jax.nn.leaky_relu(latent.reshape(N, L) @ params["wc"] + params["bc"], 0.4)
    h = jax.nn.leaky_relu(x2[:, :, None] * params["w_in"][0] + params["b_in"][0], 0.4)
    cp = cond[:, :, None] * params["w_cp"][0] + params["b_cp"][0]
    h = h + cp + params["step_table"][i_flat][:, None, :]

    hp = jnp.pad(h, ((0, 0), (1, 1), (0, 0)))
    acc = jnp.zeros((N, D, C), jnp.float32) + params["b_mid"][0]
    for k in range(3):
        acc = acc + hp[:, k:k + D, :] @ params["w_mid"][k]
    h = jax.nn.leaky_relu(acc, 0.4)

    hp = jnp.pad(h, ((0, 0), (1, 1), (0, 0)))
    out = jnp.zeros((N, D, 1), jnp.float32) + params["b_out"][0]
    for k in range(3):
        out = out + hp[:, k:k + D, :] @ params["w_out"][k]
    return out.reshape(B, T, D)


def make_params(D, L, C, max_steps=100):
    # DiffusionEmbedding sin/cos table (dim=target_dim=D, max_steps=100)
    steps = jnp.arange(max_steps, dtype=jnp.float32)[:, None]
    dims = jnp.arange(D, dtype=jnp.float32)[None, :]
    tab = steps * 10.0 ** (dims * 4.0 / D)
    time_table = jnp.concatenate([jnp.sin(tab), jnp.cos(tab)], axis=1)    # (max_steps, 2D)

    key = jax.random.PRNGKey(42)
    ks = jax.random.split(key, 16)
    g = lambda kk, shp, s=0.2: jax.random.normal(kk, shp, jnp.float32) * s
    return dict(
        time_table=time_table,
        step_table=g(ks[0], (max_steps, C), 0.5),
        w1=g(ks[1], (2 * D, D)), b1=g(ks[2], (1, D), 0.05),
        w2=g(ks[3], (D, D)),     b2=g(ks[4], (1, D), 0.05),
        w_in=g(ks[5], (1, C)),   b_in=g(ks[6], (1, C), 0.05),
        wc=g(ks[7], (L, D)),     bc=g(ks[8], (1, D), 0.05),
        w_cp=g(ks[9], (1, C)),   b_cp=g(ks[10], (1, C), 0.05),
        w_mid=g(ks[11], (3, C, C)), b_mid=g(ks[12], (1, C), 0.05),
        w_out=g(ks[13], (3, C, 1)), b_out=g(ks[14], (1, 1), 0.05),
    )


if __name__ == "__main__":
    B, T, D, L, C, MAX_STEPS = 2, 4, 16, 24, 8, 100
    params = make_params(D, L, C, MAX_STEPS)

    key = jax.random.PRNGKey(0)
    kx, kt, ki, kl = jax.random.split(key, 4)
    x = jax.random.normal(kx, (B, T, D), jnp.float32)
    t = jax.random.randint(kt, (B, T, 1), 0, MAX_STEPS)
    i = jax.random.randint(ki, (B, T, 1), 0, MAX_STEPS)
    latent = jax.random.normal(kl, (B, T, L), jnp.float32)
    y_ref = reference_forward(params, x, t, i, latent)

    # f32-matmul path: tight structural check against the plain-JAX reference
    y32 = jax.block_until_ready(
        denoise_wrapper_forward(params, x, t, i, latent, compute_dtype=jnp.float32))
    assert y32.shape == x.shape
    err32 = float(jnp.max(jnp.abs(y32 - y_ref)))
    assert jnp.allclose(y32, y_ref, atol=1e-3, rtol=1e-3), f"f32 max abs err {err32}"

    # default bf16-matmul path (f32 accumulation, f32 biases/store) -> looser tolerance
    ybf = jax.block_until_ready(denoise_wrapper_forward(params, x, t, i, latent))
    errbf = float(jnp.max(jnp.abs(ybf - y_ref)))
    assert jnp.allclose(ybf, y_ref, atol=5e-2, rtol=5e-2), f"bf16 max abs err {errbf}"

    # larger N, not a multiple of the tile -> exercises the multi-tile grid + lane padding
    B2, T2 = 5, 77
    kx2, kt2, ki2, kl2 = jax.random.split(jax.random.PRNGKey(1), 4)
    xb = jax.random.normal(kx2, (B2, T2, D), jnp.float32)
    tb = jax.random.randint(kt2, (B2, T2, 1), 0, MAX_STEPS)
    ib = jax.random.randint(ki2, (B2, T2, 1), 0, MAX_STEPS)
    latb = jax.random.normal(kl2, (B2, T2, L), jnp.float32)
    yb_ref = reference_forward(params, xb, tb, ib, latb)

    yb32 = jax.block_until_ready(
        denoise_wrapper_forward(params, xb, tb, ib, latb, tile_n=128,
                                compute_dtype=jnp.float32))
    errb32 = float(jnp.max(jnp.abs(yb32 - yb_ref)))
    assert jnp.allclose(yb32, yb_ref, atol=1e-3, rtol=1e-3), f"f32 max abs err {errb32}"

    ybbf = jax.block_until_ready(
        denoise_wrapper_forward(params, xb, tb, ib, latb, tile_n=128))
    errbbf = float(jnp.max(jnp.abs(ybbf - yb_ref)))
    assert jnp.allclose(ybbf, yb_ref, atol=5e-2, rtol=5e-2), f"bf16 max abs err {errbbf}"

    print("KERNEL_OK")
</pallas_src>

<mosaic_0001>
module attributes {stable_mosaic.version = 11 : i64} {
  func.func @denoise_wrapper_kernel(%arg0: i32, %arg1: memref<48x128xf32, #tpu.memory_space<vmem>>, %arg2: memref<128x48xf32, #tpu.memory_space<vmem>>, %arg3: memref<128x48xf32, #tpu.memory_space<vmem>>, %arg4: memref<128x48xf32, #tpu.memory_space<vmem>>, %arg5: memref<128x128xf32, #tpu.memory_space<vmem>>, %arg6: memref<16x128xf32, #tpu.memory_space<vmem>>, %arg7: memref<128x4xf32, #tpu.memory_space<vmem>>, %arg8: memref<1x1xf32, #tpu.memory_space<smem>>, %arg9: memref<16x128xf32, #tpu.memory_space<vmem>>) attributes {dimension_semantics = [#tpu.dimension_semantics<parallel>], iteration_bounds = array<i64: 1>, scalar_prefetch = 0 : i64, scratch_operands = 0 : i64, tpu.core_type = #tpu.core_type<tc>, window_params = [{transform_indices = @transform_0, window_bounds = array<i64: 48, 128>}, {pipeline_mode = #tpu.pipeline_mode<synchronous>, transform_indices = @transform_1, window_bounds = array<i64: 128, 48>}, {pipeline_mode = #tpu.pipeline_mode<synchronous>, transform_indices = @transform_2, window_bounds = array<i64: 128, 48>}, {pipeline_mode = #tpu.pipeline_mode<synchronous>, transform_indices = @transform_3, window_bounds = array<i64: 128, 48>}, {pipeline_mode = #tpu.pipeline_mode<synchronous>, transform_indices = @transform_4, window_bounds = array<i64: 128, 128>}, {pipeline_mode = #tpu.pipeline_mode<synchronous>, transform_indices = @transform_5, window_bounds = array<i64: 16, 128>}, {pipeline_mode = #tpu.pipeline_mode<synchronous>, transform_indices = @transform_6, window_bounds = array<i64: 128, 4>}, {transform_indices = @transform_7, window_bounds = array<i64: 1, 1>}, {transform_indices = @transform_8, window_bounds = array<i64: 16, 128>}]} {
    %c0 = arith.constant 0 : index
    %c0_0 = arith.constant 0 : index
    %0 = vector.load %arg1[%c0, %c0_0] : memref<48x128xf32, #tpu.memory_space<vmem>>, vector<48x128xf32>
    %c0_1 = arith.constant 0 : index
    %c0_2 = arith.constant 0 : index
    %1 = vector.load %arg7[%c0_1, %c0_2] : memref<128x4xf32, #tpu.memory_space<vmem>>, vector<128x4xf32>
    %2 = vector.extract_strided_slice %1 {offsets = [0, 0], sizes = [128, 1], strides = [1, 1]} : vector<128x4xf32> to vector<128x1xf32>
    %3 = vector.extract_strided_slice %1 {offsets = [0, 1], sizes = [128, 1], strides = [1, 1]} : vector<128x4xf32> to vector<128x1xf32>
    %4 = vector.extract_strided_slice %1 {offsets = [0, 2], sizes = [128, 1], strides = [1, 1]} : vector<128x4xf32> to vector<128x1xf32>
    %5 = vector.extract_strided_slice %1 {offsets = [0, 3], sizes = [128, 1], strides = [1, 1]} : vector<128x4xf32> to vector<128x1xf32>
    %c0_3 = arith.constant 0 : index
    %c0_4 = arith.constant 0 : index
    %6 = vector.load %arg2[%c0_3, %c0_4] : memref<128x48xf32, #tpu.memory_space<vmem>>, vector<128x48xf32>
    %cst = arith.constant dense<0.000000e+00> : vector<128x128xf32>
    %7 = tpu.matmul %6, %0, %cst {dimension_numbers = #tpu.dot_dimension_numbers<[1], [0], [0], [1], [0, 0, 1, 1], [], []>} : vector<128x48xf32>, vector<48x128xf32>, vector<128x128xf32> -> vector<128x128xf32>
    %8 = vector.broadcast %2 : vector<128x1xf32> to vector<128x128xf32>
    %9 = arith.addf %7, %8 : vector<128x128xf32>
    %c0_5 = arith.constant 0 : index
    %c0_6 = arith.constant 0 : index
    %10 = vector.load %arg3[%c0_5, %c0_6] : memref<128x48xf32, #tpu.memory_space<vmem>>, vector<128x48xf32>
    %cst_7 = arith.constant dense<0.000000e+00> : vector<128x128xf32>
    %11 = tpu.matmul %10, %0, %cst_7 {dimension_numbers = #tpu.dot_dimension_numbers<[1], [0], [0], [1], [0, 0, 1, 1], [], []>} : vector<128x48xf32>, vector<48x128xf32>, vector<128x128xf32> -> vector<128x128xf32>
    %12 = vector.broadcast %3 : vector<128x1xf32> to vector<128x128xf32>
    %13 = arith.addf %11, %12 : vector<128x128xf32>
    %c0_8 = arith.constant 0 : index
    %c0_9 = arith.constant 0 : index
    %14 = vector.load %arg4[%c0_8, %c0_9] : memref<128x48xf32, #tpu.memory_space<vmem>>, vector<128x48xf32>
    %cst_10 = arith.constant dense<0.000000e+00> : vector<128x128xf32>
    %15 = tpu.matmul %14, %0, %cst_10 {dimension_numbers = #tpu.dot_dimension_numbers<[1], [0], [0], [1], [0, 0, 1, 1], [], []>} : vector<128x48xf32>, vector<48x128xf32>, vector<128x128xf32> -> vector<128x128xf32>
    %cst_11 = arith.constant 0.000000e+00 : f32
    %16 = vector.broadcast %cst_11 : f32 to vector<128x128xf32>
    %17 = arith.cmpf oge, %9, %16 : vector<128x128xf32>
    %cst_12 = arith.constant 4.000000e-01 : f32
    %18 = vector.broadcast %cst_12 : f32 to vector<128x128xf32>
    %19 = arith.mulf %18, %9 : vector<128x128xf32>
    %20 = arith.select %17, %9, %19 : vector<128x128xi1>, vector<128x128xf32>
    %cst_13 = arith.constant 0.000000e+00 : f32
    %21 = vector.broadcast %cst_13 : f32 to vector<128x128xf32>
    %22 = arith.cmpf oge, %13, %21 : vector<128x128xf32>
    %cst_14 = arith.constant 4.000000e-01 : f32
    %23 = vector.broadcast %cst_14 : f32 to vector<128x128xf32>
    %24 = arith.mulf %23, %13 : vector<128x128xf32>
    %25 = arith.select %22, %13, %24 : vector<128x128xi1>, vector<128x128xf32>
    %26 = vector.broadcast %4 : vector<128x1xf32> to vector<128x128xf32>
    %27 = arith.mulf %26, %25 : vector<128x128xf32>
    %28 = arith.addf %20, %27 : vector<128x128xf32>
    %29 = arith.addf %28, %15 : vector<128x128xf32>
    %c0_15 = arith.constant 0 : index
    %c0_16 = arith.constant 0 : index
    %30 = vector.load %arg5[%c0_15, %c0_16] : memref<128x128xf32, #tpu.memory_space<vmem>>, vector<128x128xf32>
    %cst_17 = arith.constant dense<0.000000e+00> : vector<128x128xf32>
    %31 = tpu.matmul %30, %29, %cst_17 {dimension_numbers = #tpu.dot_dimension_numbers<[1], [0], [0], [1], [0, 0, 1, 1], [], []>} : vector<128x128xf32>, vector<128x128xf32>, vector<128x128xf32> -> vector<128x128xf32>
    %32 = vector.broadcast %5 : vector<128x1xf32> to vector<128x128xf32>
    %33 = arith.addf %31, %32 : vector<128x128xf32>
    %cst_18 = arith.constant 0.000000e+00 : f32
    %34 = vector.broadcast %cst_18 : f32 to vector<128x128xf32>
    %35 = arith.cmpf oge, %33, %34 : vector<128x128xf32>
    %cst_19 = arith.constant 4.000000e-01 : f32
    %36 = vector.broadcast %cst_19 : f32 to vector<128x128xf32>
    %37 = arith.mulf %36, %33 : vector<128x128xf32>
    %38 = arith.select %35, %33, %37 : vector<128x128xi1>, vector<128x128xf32>
    %c0_20 = arith.constant 0 : index
    %c0_21 = arith.constant 0 : index
    %39 = vector.load %arg6[%c0_20, %c0_21] : memref<16x128xf32, #tpu.memory_space<vmem>>, vector<16x128xf32>
    %cst_22 = arith.constant dense<0.000000e+00> : vector<16x128xf32>
    %40 = tpu.matmul %39, %38, %cst_22 {dimension_numbers = #tpu.dot_dimension_numbers<[1], [0], [0], [1], [0, 0, 1, 1], [], []>} : vector<16x128xf32>, vector<128x128xf32>, vector<16x128xf32> -> vector<16x128xf32>
    %c0_23 = arith.constant 0 : index
    %c0_24 = arith.constant 0 : index
    %41 = memref.load %arg8[%c0_23, %c0_24] : memref<1x1xf32, #tpu.memory_space<smem>>
    %42 = vector.broadcast %41 : f32 to vector<16x128xf32>
    %43 = arith.addf %40, %42 : vector<16x128xf32>
    %c0_25 = arith.constant 0 : index
    %c0_26 = arith.constant 0 : index
    %44 = vector.load %arg9[%c0_25, %c0_26] : memref<16x128xf32, #tpu.memory_space<vmem>>, vector<16x128xf32>
    tpu.vector_store %arg9[%c0_25, %c0_26], %43 {strides = array<i32>} : memref<16x128xf32, #tpu.memory_space<vmem>>, vector<16x128xf32>,
    return
  }
  func.func @transform_0(%arg0: i32) -> (i32, i32) {
    %c0_i32 = arith.constant 0 : i32
    %c0_i32_0 = arith.constant 0 : i32
    return %c0_i32, %arg0 : i32, i32
  }
  func.func @transform_1(%arg0: i32) -> (i32, i32) {
    %c0_i32 = arith.constant 0 : i32
    %c0_i32_0 = arith.constant 0 : i32
    %c0_i32_1 = arith.constant 0 : i32
    return %c0_i32, %c0_i32_0 : i32, i32
  }
  func.func @transform_2(%arg0: i32) -> (i32, i32) {
    %c0_i32 = arith.constant 0 : i32
    %c0_i32_0 = arith.constant 0 : i32
    %c0_i32_1 = arith.constant 0 : i32
    return %c0_i32, %c0_i32_0 : i32, i32
  }
  func.func @transform_3(%arg0: i32) -> (i32, i32) {
    %c0_i32 = arith.constant 0 : i32
    %c0_i32_0 = arith.constant 0 : i32
    %c0_i32_1 = arith.constant 0 : i32
    return %c0_i32, %c0_i32_0 : i32, i32
  }
  func.func @transform_4(%arg0: i32) -> (i32, i32) {
    %c0_i32 = arith.constant 0 : i32
    %c0_i32_0 = arith.constant 0 : i32
    %c0_i32_1 = arith.constant 0 : i32
    return %c0_i32, %c0_i32_0 : i32, i32
  }
  func.func @transform_5(%arg0: i32) -> (i32, i32) {
    %c0_i32 = arith.constant 0 : i32
    %c0_i32_0 = arith.constant 0 : i32
    %c0_i32_1 = arith.constant 0 : i32
    return %c0_i32, %c0_i32_0 : i32, i32
  }
  func.func @transform_6(%arg0: i32) -> (i32, i32) {
    %c0_i32 = arith.constant 0 : i32
    %c0_i32_0 = arith.constant 0 : i32
    %c0_i32_1 = arith.constant 0 : i32
    return %c0_i32, %c0_i32_0 : i32, i32
  }
  func.func @transform_7(%arg0: i32) -> (i32, i32) {
    %c0_i32 = arith.constant 0 : i32
    %c0_i32_0 = arith.constant 0 : i32
    %c0_i32_1 = arith.constant 0 : i32
    return %c0_i32, %c0_i32_0 : i32, i32
  }
  func.func @transform_8(%arg0: i32) -> (i32, i32) {
    %c0_i32 = arith.constant 0 : i32
    %c0_i32_0 = arith.constant 0 : i32
    return %c0_i32, %arg0 : i32, i32
  }
}

</mosaic_0001>

<bundles_post_ra>
// kernel: tpu_custom_call.1
= control target key start
LH: loop header
LB: loop body
LE: loop exit
PB: predicated region body
PF: predicated region fallthrough
CT: control target
= control target key end

     0   :  { %v1173_v2 = vmov 1   ;;  %s1867_s0 = inlined_call_operand.vmem [shape: f32[48,128], index: 0, kind: input, shape index: {}]   ;;  %s1868_s1 = inlined_call_operand.vmem [shape: f32[128,48], index: 1, kind: input, shape index: {}]   ;;  %s1869_s2 = inlined_call_operand.vmem [shape: f32[128,48], index: 2, kind: input, shape index: {}]   ;;  %s1870_s3 = inlined_call_operand.vmem [shape: f32[128,48], index: 3, kind: input, shape index: {}]   ;;  %s1871_s4 = inlined_call_operand.vmem [shape: f32[128,128], index: 4, kind: input, shape index: {}]   ;;  %s1872_s5 = inlined_call_operand.vmem [shape: f32[16,128], index: 5, kind: input, shape index: {}]   ;;  %s1873_s6 = inlined_call_operand.vmem [shape: f32[128,4], index: 6, kind: input, shape index: {}]   ;;  %s1874_s7 = inlined_call_operand.<no memory space> [shape: f32[1,1], index: 7, kind: input, shape index: {}]   ;;  %s1875_s8 = inlined_call_operand.hbm [shape: f32[16,128], index: 8, kind: output, shape index: {}]  }
   0x1   :  { %v36_v0 = vld [vmem:[%s1867_s0 + $0x28] sm:$0xff]  ;;  %v1231_v1 = vld [vmem:[%s1873_s6 + $0x78] sm:$0xff]  ;;  %1123 = vset.pattern.permute.xlu2 %v1173_v2  ;;  %1121 = vset.pattern.permute.xlu1 %v1173_v2  ;;  %v1238_v3 = vld [vmem:[%s1873_s6 + $0x70] sm:$0xff] }
   0x2   :  { %v1243_v4 = vld [vmem:[%s1873_s6 + $0x68] sm:$0xff]  ;;  %1120 = vset.pattern.permute.xlu0 %v1173_v2  ;;  %208 = vmatpush.msra.mxu0 %v36_v0  ;;  %v35_v5 = vld [vmem:[%s1867_s0 + $0x20] sm:$0xff]  ;;  %v34_v6 = vld [vmem:[%s1867_s0 + $0x18] sm:$0xff] }
   0x3   :  { %401 = vmatpush.msra.mxu1 %v36_v0  ;;  %340 = vperm.xlu0 %1120, %v1231_v1   ;;  %v33_v7 = vld [vmem:[%s1867_s0 + $0x10] sm:$0xff]  ;;  %v32_v8 = vld [vmem:[%s1867_s0 + $0x8] sm:$0xff] }
   0x4   :  { %336 = vperm.xlu1 %1121, %v1238_v3   ;;  %332 = vperm.xlu2 %1123, %v1243_v4  }
   0x5   :  { %209 = vmatpush.msra.mxu0 %v35_v5  ;;  %402 = vmatpush.msra.mxu1 %v35_v5 }
   0x6   :  { %530 = vmatpush.msra.mxu2 %v36_v0 }
   0x7   :  { %210 = vmatpush.msra.mxu0 %v34_v6  ;;  %403 = vmatpush.msra.mxu1 %v34_v6 }
   0x8   :  { %531 = vmatpush.msra.mxu2 %v35_v5 }
   0x9   :  { %14 = vsyncpa [#allocation4], 0  ;;  %211 = vmatpush.msra.mxu0 %v33_v7  ;;  %404 = vmatpush.msra.mxu1 %v33_v7  ;;  %v1264_v9 = vld [vmem:[%s1873_s6 + $0x50] sm:$0xff]  ;;  %v1174_v10 = vmov 0   ;;  %v1175_v11 = vmov 2   ;;  %v31_v12 = vld [vmem:[%s1867_s0] sm:$0xff] }
   0xa   :  { %532 = vmatpush.msra.mxu2 %v34_v6  ;;  %v53_v13 = vld [vmem:[%s1868_s1] sm:$0xff]  ;;  %vm149_vm0 = vcmask 392192   ;;  %v1288_v16 = vld [vmem:[%s1873_s6 + $0x28] sm:$0xff]  ;;  %v1315_v21 = vld [vmem:[%s1873_s6 + $0x58] sm:$0xff]  ;;  %s1177_s13 = smov [#allocation3]   ;;  %s1021_s17 = sshll.u32 %s1875_s8, 4  ;;  %s1022_s17 = int_to_ptr.hbm [resolvable:$true] %s1021_s17 }
   0xb   :  { %212 = vmatpush.msra.mxu0 %v32_v8  ;;  %405 = vmatpush.msra.mxu1 %v32_v8  ;;  %v263_v14 = vld [vmem:[%s1869_s2] sm:$0xff]  ;;  %1884 = vst [vmem:[#allocation6_spill] sm:$0xff] %v1288_v16  ;;  %v54_v18 = vld [vmem:[%s1868_s1 + $0x8] sm:$0xff]  ;;  %v55_v22 = vld [vmem:[%s1868_s1 + $0x10] sm:$0xff]  ;;  %s1019_s14 = sshll.u32 %s1177_s13, 4  ;;  %s1179_s18 = smov 8   ;;  %s1020_s14 = int_to_ptr.vmem [resolvable:$true] %s1019_s14 }
   0xc   :  { %1122 = vset.pattern.permute.xlu1 %v1174_v10  ;;  %1124 = vset.pattern.permute.xlu2 %v1175_v11  ;;  %v456_v15 = vld [vmem:[%s1870_s3] sm:$0xff]  ;;  %v264_v19 = vld [vmem:[%s1869_s2 + $0x8] sm:$0xff]  ;;  %v265_v23 = vld [vmem:[%s1869_s2 + $0x10] sm:$0xff] }
   0xd   :  { %320 = vperm.xlu0 %1120, %v1264_v9   ;;  %533 = vmatpush.msra.mxu2 %v33_v7  ;;  %v1294_v17 = vld [vmem:[%s1873_s6 + $0x60] sm:$0xff]  ;;  %v457_v20 = vld [vmem:[%s1870_s3 + $0x8] sm:$0xff]  ;;  %v458_v24 = vld [vmem:[%s1870_s3 + $0x10] sm:$0xff] }
   0xe   :  { %141 = vperm.xlu1 %1122, %v1238_v3   ;;  %742 = vperm.xlu2 %1124, %v1231_v1   ;;  %v1335_v25 = vld [vmem:[%s1873_s6 + $0x48] sm:$0xff]  ;;  %v56_v26 = vld [vmem:[%s1868_s1 + $0x18] sm:$0xff]  ;;  %v1357_v29 = vld [vmem:[%s1873_s6 + $0x20] sm:$0xff] }
   0xf   :  { %213 = vmatpush.msra.mxu0 %v31_v12  ;;  %406 = vmatpush.msra.mxu1 %v31_v12  ;;  %v266_v27 = vld [vmem:[%s1869_s2 + $0x18] sm:$0xff]  ;;  %1885 = vst [vmem:[#allocation7_spill] sm:$0xff] %v1357_v29  ;;  %v57_v30 = vld [vmem:[%s1868_s1 + $0x20] sm:$0xff]  ;;  %v58_v33 = vld [vmem:[%s1868_s1 + $0x28] sm:$0xff] }
  0x10   :  { %1033 = vmatmul.msk.f32.vlgmr.msra.gmra.mxu0 %vm149_vm0, %v53_v13  ;;  %1049 = vmatmul.msk.f32.vlgmr.msra.gmra.mxu1 %vm149_vm0, %v263_v14  ;;  %v459_v28 = vld [vmem:[%s1870_s3 + $0x18] sm:$0xff]  ;;  %v267_v31 = vld [vmem:[%s1869_s2 + $0x20] sm:$0xff]  ;;  %v268_v34 = vld [vmem:[%s1869_s2 + $0x28] sm:$0xff] }
  0x11   :  { %534 = vmatpush.msra.mxu2 %v32_v8  ;;  %v460_v32 = vld [vmem:[%s1870_s3 + $0x20] sm:$0xff]  ;;  %v461_v35 = vld [vmem:[%s1870_s3 + $0x28] sm:$0xff]  ;;  %v59_v36 = vld [vmem:[%s1868_s1 + $0x30] sm:$0xff] }
  0x12   :  { %v269_v37 = vld [vmem:[%s1869_s2 + $0x30] sm:$0xff]  ;;  %v1402_v38 = vld [vmem:[%s1873_s6 + $0x40] sm:$0xff]  ;;  %v60_v40 = vld [vmem:[%s1868_s1 + $0x38] sm:$0xff] }
  0x13   :  { %535 = vmatpush.msra.mxu2 %v31_v12  ;;  %1886 = vst [vmem:[#allocation8_spill] sm:$0xff] %v1402_v38  ;;  %v462_v39 = vld [vmem:[%s1870_s3 + $0x30] sm:$0xff]  ;;  %v270_v41 = vld [vmem:[%s1869_s2 + $0x38] sm:$0xff]  ;;  %v61_v44 = vld [vmem:[%s1868_s1 + $0x40] sm:$0xff] }
  0x14   :  { %1065 = vmatmul.msk.f32.vlgmr.msra.gmra.mxu2 %vm149_vm0, %v456_v15  ;;  %v1425_v42 = vld [vmem:[%s1873_s6 + $0x38] sm:$0xff]  ;;  %v271_v45 = vld [vmem:[%s1869_s2 + $0x40] sm:$0xff]  ;;  %v1452_v47 = vld [vmem:[%s1873_s6 + $0x30] sm:$0xff] }
  0x15   :  { %300 = vperm.xlu0 %1120, %v1288_v16   ;;  %v463_v43 = vld [vmem:[%s1870_s3 + $0x38] sm:$0xff]  ;;  %v1444_v46 = vld [vmem:[%s1873_s6] sm:$0xff]  ;;  %1888 = vst [vmem:[#allocation10_spill] sm:$0xff] %v1452_v47  ;;  %v62_v49 = vld [vmem:[%s1868_s1 + $0x48] sm:$0xff] }
  0x16   :  { %136 = vperm.xlu1 %1122, %v1243_v4   ;;  %1125 = vset.pattern.permute.xlu2 %v1173_v2  ;;  %1887 = vst [vmem:[#allocation9_spill] sm:$0xff] %v1444_v46  ;;  %v464_v48 = vld [vmem:[%s1870_s3 + $0x40] sm:$0xff]  ;;  %v272_v50 = vld [vmem:[%s1869_s2 + $0x48] sm:$0xff]  ;;  %v63_v52 = vld [vmem:[%s1868_s1 + $0x50] sm:$0xff] }
  0x17   :  { %328 = vperm.xlu2 %1125, %v1294_v17   ;;  %v465_v51 = vld [vmem:[%s1870_s3 + $0x48] sm:$0xff]  ;;  %v273_v53 = vld [vmem:[%s1869_s2 + $0x50] sm:$0xff]  ;;  %v64_v56 = vld [vmem:[%s1868_s1 + $0x58] sm:$0xff] }
  0x18   :  { %1034 = vmatmul.msk.f32.gmra.mxu0 %vm149_vm0, %v54_v18  ;;  %1050 = vmatmul.msk.f32.gmra.mxu1 %vm149_vm0, %v264_v19  ;;  %v466_v55 = vld [vmem:[%s1870_s3 + $0x50] sm:$0xff]  ;;  %v274_v57 = vld [vmem:[%s1869_s2 + $0x58] sm:$0xff]  ;;  %v65_v60 = vld [vmem:[%s1868_s1 + $0x60] sm:$0xff] }
  0x19   :  { %v467_v59 = vld [vmem:[%s1870_s3 + $0x58] sm:$0xff]  ;;  %v275_v61 = vld [vmem:[%s1869_s2 + $0x60] sm:$0xff]  ;;  %v66_v5 = vld [vmem:[%s1868_s1 + $0x68] sm:$0xff] }
  0x1a   :  { %v468_v62 = vld [vmem:[%s1870_s3 + $0x60] sm:$0xff]  ;;  %v1527_v0 = vld [vmem:[%s1873_s6 + $0x18] sm:$0xff]  ;;  %v276_v6 = vld [vmem:[%s1869_s2 + $0x68] sm:$0xff] }
  0x1b   :  { %1889 = vst [vmem:[#allocation11_spill] sm:$0xff] %v1527_v0  ;;  %v469_v8 = vld [vmem:[%s1870_s3 + $0x68] sm:$0xff]  ;;  %v1550_v13 = vld [vmem:[%s1873_s6 + $0x10] sm:$0xff] }
  0x1c   :  { %1066 = vmatmul.msk.f32.gmra.mxu2 %vm149_vm0, %v457_v20  ;;  %1890 = vst [vmem:[#allocation12_spill] sm:$0xff] %v1550_v13  ;;  %v67_v14 = vld [vmem:[%s1868_s1 + $0x70] sm:$0xff]  ;;  %v1575_v20 = vld [vmem:[%s1873_s6 + $0x8] sm:$0xff] }
  0x1d   :  { %1134 = vset.pattern.permute.xlu0 %v1174_v10  ;;  %v277_v15 = vld [vmem:[%s1869_s2 + $0x70] sm:$0xff]  ;;  %1891 = vst [vmem:[#allocation13_spill] sm:$0xff] %v1575_v20 }
  0x1e   :  { %131 = vperm.xlu1 %1122, %v1294_v17   ;;  %146 = vperm.xlu0 %1134, %v1231_v1  }
  0x1f   :  { %324 = vperm.xlu2 %1125, %v1315_v21  }
  0x20   :  { %1035 = vmatmul.msk.f32.gmra.mxu0 %vm149_vm0, %v55_v22  ;;  %1051 = vmatmul.msk.f32.gmra.mxu1 %vm149_vm0, %v265_v23  ;;  %v68_v22 = vld [vmem:[%s1868_s1 + $0x78] sm:$0xff] }
  0x21   :  { %v278_v23 = vld [vmem:[%s1869_s2 + $0x78] sm:$0xff] }
  0x24   :  { %1067 = vmatmul.msk.f32.gmra.mxu2 %vm149_vm0, %v458_v24 }
  0x26   :  { %1126 = vset.pattern.permute.xlu1 %v1175_v11  ;;  %116 = vperm.xlu0 %1134, %v1335_v25  }
  0x27   :  { %734 = vperm.xlu1 %1126, %v1243_v4   ;;  %1127 = vset.pattern.permute.xlu2 %v1174_v10 }
  0x28   :  { %1036 = vmatmul.msk.f32.gmra.mxu0 %vm149_vm0, %v56_v26  ;;  %1052 = vmatmul.msk.f32.gmra.mxu1 %vm149_vm0, %v266_v27  ;;  %v471_v26 = vld [vmem:[%s1870_s3 + $0x78] sm:$0xff] }
  0x29   :  { %126 = vperm.xlu2 %1127, %v1315_v21  }
  0x2c   :  { %1068 = vmatmul.msk.f32.gmra.mxu2 %vm149_vm0, %v459_v28 }
  0x2e   :  { %91 = vperm.xlu0 %1134, %v1357_v29  }
  0x2f   :  { %730 = vperm.xlu1 %1126, %v1294_v17  }
  0x30   :  { %1037 = vmatmul.msk.f32.gmra.mxu0 %vm149_vm0, %v57_v30  ;;  %1053 = vmatmul.msk.f32.gmra.mxu1 %vm149_vm0, %v267_v31 }
  0x31   :  { %121 = vperm.xlu2 %1127, %v1264_v9  }
  0x34   :  { %1069 = vmatmul.msk.f32.gmra.mxu2 %vm149_vm0, %v460_v32 }
  0x36   :  { %1137 = vset.pattern.permute.xlu0 %v1175_v11 }
  0x37   :  { %1128 = vset.pattern.permute.xlu1 %v1173_v2  ;;  %738 = vperm.xlu0 %1137, %v1238_v3  }
  0x38   :  { %1038 = vmatmul.msk.f32.gmra.mxu0 %vm149_vm0, %v58_v33  ;;  %1054 = vmatmul.msk.f32.gmra.mxu1 %vm149_vm0, %v268_v34 }
  0x39   :  { %1129 = vset.pattern.permute.xlu2 %v1175_v11  ;;  %316 = vperm.xlu1 %1128, %v1335_v25  }
  0x3a   :  { %726 = vperm.xlu2 %1129, %v1315_v21  }
  0x3c   :  { %1070 = vmatmul.msk.f32.gmra.mxu2 %vm149_vm0, %v461_v35 }
  0x3f   :  { %718 = vperm.xlu0 %1137, %v1335_v25  }
  0x40   :  { %1039 = vmatmul.msk.f32.gmra.mxu0 %vm149_vm0, %v59_v36  ;;  %1055 = vmatmul.msk.f32.gmra.mxu1 %vm149_vm0, %v269_v37 }
  0x41   :  { %312 = vperm.xlu1 %1128, %v1402_v38  }
  0x42   :  { %722 = vperm.xlu2 %1129, %v1264_v9  }
  0x44   :  { %1071 = vmatmul.msk.f32.gmra.mxu2 %vm149_vm0, %v462_v39 }
  0x47   :  { %698 = vperm.xlu0 %1137, %v1357_v29  }
  0x48   :  { %1040 = vmatmul.msk.f32.gmra.mxu0 %vm149_vm0, %v60_v40  ;;  %1056 = vmatmul.msk.f32.gmra.mxu1 %vm149_vm0, %v270_v41 }
  0x49   :  { %1130 = vset.pattern.permute.xlu1 %v1174_v10 }
  0x4a   :  { %1131 = vset.pattern.permute.xlu2 %v1173_v2  ;;  %111 = vperm.xlu1 %1130, %v1402_v38  }
  0x4b   :  { %308 = vperm.xlu2 %1131, %v1425_v42  }
  0x4c   :  { %1072 = vmatmul.msk.f32.gmra.mxu2 %vm149_vm0, %v463_v43 }
  0x4f   :  { %1142 = vset.pattern.permute.xlu0 %v1173_v2 }
  0x50   :  { %1041 = vmatmul.msk.f32.gmra.mxu0 %vm149_vm0, %v61_v44  ;;  %1057 = vmatmul.msk.f32.gmra.mxu1 %vm149_vm0, %v271_v45 }
  0x51   :  { %280 = vperm.xlu0 %1142, %v1444_v46  }
  0x52   :  { %106 = vperm.xlu1 %1130, %v1425_v42  }
  0x53   :  { %304 = vperm.xlu2 %1131, %v1452_v47  }
  0x54   :  { %1073 = vmatmul.msk.f32.gmra.mxu2 %vm149_vm0, %v464_v48 }
  0x58   :  { %1042 = vmatmul.msk.f32.gmra.mxu0 %vm149_vm0, %v62_v49  ;;  %1058 = vmatmul.msk.f32.gmra.mxu1 %vm149_vm0, %v272_v50 }
  0x5a   :  { %1132 = vset.pattern.permute.xlu1 %v1175_v11 }
  0x5b   :  { %714 = vperm.xlu1 %1132, %v1402_v38   ;;  %1133 = vset.pattern.permute.xlu2 %v1174_v10 }
  0x5c   :  { %1074 = vmatmul.msk.f32.gmra.mxu2 %vm149_vm0, %v465_v51  ;;  %101 = vperm.xlu2 %1133, %v1452_v47  }
  0x5e   :  { %v1483_v54 = vpop.permute.xlu2 %332 }
  0x60   :  { %1043 = vmatmul.msk.f32.gmra.mxu0 %vm149_vm0, %v63_v52  ;;  %1059 = vmatmul.msk.f32.gmra.mxu1 %vm149_vm0, %v273_v53 }
  0x63   :  { %710 = vperm.xlu1 %1132, %v1425_v42  }
  0x64   :  { %1075 = vmatmul.msk.f32.gmra.mxu2 %vm149_vm0, %v466_v55  ;;  %96 = vperm.xlu2 %1133, %v1288_v16  }
  0x68   :  { %1044 = vmatmul.msk.f32.gmra.mxu0 %vm149_vm0, %v64_v56  ;;  %1060 = vmatmul.msk.f32.gmra.mxu1 %vm149_vm0, %v274_v57  ;;  %v1501_v58 = vpop.permute.xlu2 %742 }
  0x6b   :  { %1135 = vset.pattern.permute.xlu1 %v1173_v2 }
  0x6c   :  { %1076 = vmatmul.msk.f32.gmra.mxu2 %vm149_vm0, %v467_v59  ;;  %1136 = vset.pattern.permute.xlu2 %v1175_v11 }
  0x6d   :  { %296 = vperm.xlu1 %1135, %v1357_v29   ;;  %706 = vperm.xlu2 %1136, %v1452_v47  }
  0x70   :  { %1045 = vmatmul.msk.f32.gmra.mxu0 %vm149_vm0, %v65_v60  ;;  %1061 = vmatmul.msk.f32.gmra.mxu1 %vm149_vm0, %v275_v61 }
  0x71   :  { %v1522_v63 = vpop.permute.xlu2 %328 }
  0x74   :  { %1077 = vmatmul.msk.f32.gmra.mxu2 %vm149_vm0, %v468_v62 }
  0x75   :  { %292 = vperm.xlu1 %1135, %v1527_v0   ;;  %702 = vperm.xlu2 %1136, %v1288_v16   ;;  %v1606_v32 = vpop.permute.xlu0 %340 }
  0x76   :  { %v1538_v7 = vpop.permute.xlu1 %336 }
  0x78   :  { %1046 = vmatmul.msk.f32.gmra.mxu0 %vm149_vm0, %v66_v5  ;;  %1062 = vmatmul.msk.f32.gmra.mxu1 %vm149_vm0, %v276_v6 }
  0x79   :  { %v1545_v12 = vpop.permute.xlu2 %324 }
  0x7c   :  { %1078 = vmatmul.msk.f32.gmra.mxu2 %vm149_vm0, %v469_v8 }
  0x7d   :  { %1138 = vset.pattern.permute.xlu1 %v1174_v10  ;;  %1139 = vset.pattern.permute.xlu2 %v1173_v2  ;;  %v470_v2 = vld [vmem:[%s1870_s3 + $0x70] sm:$0xff] }
  0x7e   :  { %86 = vperm.xlu1 %1138, %v1527_v0   ;;  %288 = vperm.xlu2 %1139, %v1550_v13  }
  0x7f   :  { %v1626_v41 = vpop.permute.xlu0 %320 }
  0x80   :  { %1047 = vmatmul.msk.f32.gmra.mxu0 %vm149_vm0, %v67_v14  ;;  %1063 = vmatmul.msk.f32.gmra.mxu1 %vm149_vm0, %v277_v15  ;;  %v1565_v18 = vpop.permute.xlu1 %141 }
  0x83   :  { %v1570_v19 = vpop.permute.xlu2 %126 }
  0x84   :  { %1079 = vmatmul.msk.f32.gmra.mxu2 %vm149_vm0, %v470_v2 }
  0x86   :  { %81 = vperm.xlu1 %1138, %v1550_v13   ;;  %284 = vperm.xlu2 %1139, %v1575_v20  }
  0x87   :  { %v301_v51 = vpop.permute.xlu0 %300 }
  0x88   :  { %1048 = vmatmul.msk.f32.gmra.mxu0 %vm149_vm0, %v68_v22  ;;  %1064 = vmatmul.msk.f32.gmra.mxu1 %vm149_vm0, %v278_v23  ;;  %v1588_v24 = vpop.permute.xlu1 %136 }
  0x8b   :  { %v1593_v27 = vpop.permute.xlu2 %121 }
  0x8c   :  { %1080 = vmatmul.msk.f32.gmra.mxu2 %vm149_vm0, %v471_v26 }
  0x8d   :  { %v1596_v28 = vpop.f32.mrf.mxu0  ;;  %v1598_v30 = vpop.f32.mrf.mxu1 }
  0x8e   :  { %1892 = vst [vmem:[#allocation14_spill] sm:$0xff] %v1596_v28  ;;  %1140 = vset.pattern.permute.xlu1 %v1175_v11  ;;  %1141 = vset.pattern.permute.xlu2 %v1174_v10 }
  0x8f   :  { %1893 = vst [vmem:[#allocation15_spill] sm:$0xff] %v1598_v30  ;;  %694 = vperm.xlu1 %1140, %v1527_v0   ;;  %76 = vperm.xlu2 %1141, %v1575_v20  }
  0x90   :  { %v1604_v31 = vpop.permute.xlu1 %131  ;;  %v1649_v57 = vpop.permute.xlu0 %146 }
  0x94   :  { %v1608_v33 = vpop.permute.xlu2 %726 }
  0x95   :  { %v1610_v34 = vpop.f32.mrf.mxu0  ;;  %v1612_v35 = vpop.f32.mrf.mxu1 }
  0x96   :  { %1894 = vst [vmem:[#allocation16_spill] sm:$0xff] %v1610_v34 }
  0x97   :  { %1895 = vst [vmem:[#allocation17_spill] sm:$0xff] %v1612_v35  ;;  %690 = vperm.xlu1 %1140, %v1550_v13   ;;  %v1615_v36 = vpop.f32.mrf.mxu2  ;;  %71 = vperm.xlu2 %1141, %v1444_v46  }
  0x98   :  { %1896 = vst [vmem:[#allocation18_spill] sm:$0xff] %v1615_v36  ;;  %v1653_v6 = vpop.permute.xlu0 %116 }
  0x99   :  { %v1618_v10 = vpop.permute.xlu1 %734 }
  0x9c   :  { %v1620_v37 = vpop.permute.xlu2 %722 }
  0x9d   :  { %v1622_v39 = vpop.f32.mrf.mxu0  ;;  %v1624_v40 = vpop.f32.mrf.mxu1 }
  0x9e   :  { %1897 = vst [vmem:[#allocation19_spill] sm:$0xff] %v1622_v39 }
  0x9f   :  { %1898 = vst [vmem:[#allocation20_spill] sm:$0xff] %v1624_v40  ;;  %686 = vperm.xlu1 %1140, %v1575_v20   ;;  %v1629_v43 = vpop.f32.mrf.mxu2  ;;  %1143 = vset.pattern.permute.xlu2 %v1175_v11 }
  0xa0   :  { %1899 = vst [vmem:[#allocation21_spill] sm:$0xff] %v1629_v43  ;;  %682 = vperm.xlu2 %1143, %v1444_v46   ;;  %v92_v13 = vpop.permute.xlu0 %91 }
  0xa1   :  { %v1633_v44 = vpop.permute.xlu1 %730 }
  0xa5   :  { %v1635_v45 = vpop.f32.mrf.mxu0  ;;  %v1637_v48 = vpop.f32.mrf.mxu1 }
  0xa6   :  { %1900 = vst [vmem:[#allocation22_spill] sm:$0xff] %v1635_v45  ;;  %v309_v49 = vpop.permute.xlu2 %308 }
  0xa7   :  { %1901 = vst [vmem:[#allocation23_spill] sm:$0xff] %v1637_v48  ;;  %v1639_v50 = vpop.f32.mrf.mxu2 }
  0xa8   :  { %1902 = vst [vmem:[#allocation24_spill] sm:$0xff] %v1639_v50 }
  0xab   :  { %v1641_v52 = vpop.permute.xlu1 %316 }
  0xad   :  { %v1643_v53 = vpop.f32.mrf.mxu0  ;;  %v1645_v55 = vpop.f32.mrf.mxu1 }
  0xae   :  { %v305_v56 = vpop.permute.xlu2 %304 }
  0xaf   :  { %v1647_v11 = vpop.f32.mrf.mxu2 }
  0xb0   :  { %1903 = vst [vmem:[#allocation25_spill] sm:$0xff] %v1647_v11 }
  0xb3   :  { %v313_v59 = vpop.permute.xlu1 %312 }
  0xb5   :  { %v230_v60 = vpop.f32.mrf.mxu0  ;;  %v423_v61 = vpop.f32.mrf.mxu1 }
  0xb6   :  { %v102_v62 = vpop.permute.xlu2 %101  ;;  %v424_v0 = vadd.f32 %v423_v61, %v301_v51 }
  0xb7   :  { %v1651_v5 = vpop.f32.mrf.mxu2 }
  0xb8   :  { %v654_v29 = vmul.f32 0.4, %v424_v0  ;;  %vm638_vm3 = vcmp.ge.f32.partialorder %v424_v0, 0.0 }
  0xbc   :  { %v112_v8 = vpop.permute.xlu1 %111 }
  0xbd   :  { %v233_v14 = vpop.f32.mrf.mxu0  ;;  %v426_v15 = vpop.f32.mrf.mxu1 }
  0xbe   :  { %v97_v2 = vpop.permute.xlu2 %96  ;;  %v427_v22 = vadd.f32 %v426_v15, %v305_v56  ;;  %v234_v26 = vadd.f32 %v233_v14, %v102_v62 }
  0xbf   :  { %v552_v23 = vpop.f32.mrf.mxu2  ;;  %v231_v39 = vadd.f32 %v230_v60, %v97_v2 }
  0xc0   :  { %v655_v36 = vmul.f32 0.4, %v427_v22  ;;  %vm639_vm1 = vcmp.ge.f32.partialorder %v427_v22, 0.0  ;;  %v607_v46 = vmul.f32 0.4, %v234_v26  ;;  %vm591_vm2 = vcmp.ge.f32.partialorder %v234_v26, 0.0 }
  0xc1   :  { %v606_v14 = vmul.f32 0.4, %v231_v39  ;;  %vm590_vm4 = vcmp.ge.f32.partialorder %v231_v39, 0.0 }
  0xc2   :  { %v671_v34 = vsel %vm639_vm1, %v427_v22, %v655_v36  ;;  %v623_v30 = vsel %vm591_vm2, %v234_v26, %v607_v46  ;;  %v670_v36 = vsel %vm638_vm3, %v424_v0, %v654_v29 }
  0xc4   :  { %v107_v43 = vpop.permute.xlu1 %106 }
  0xc5   :  { %v236_v50 = vpop.f32.mrf.mxu0  ;;  %v429_v11 = vpop.f32.mrf.mxu1 }
  0xc6   :  { %v430_v56 = vadd.f32 %v429_v11, %v309_v49  ;;  %v237_v48 = vadd.f32 %v236_v50, %v107_v43 }
  0xc7   :  { %v555_v20 = vpop.f32.mrf.mxu2  ;;  %v707_v28 = vpop.permute.xlu2 %706 }
  0xc8   :  { %v751_v16 = vmul.f32 %v707_v28, %v671_v34  ;;  %v1657_v28 = vpop.permute.xlu0 %738  ;;  %v656_v46 = vmul.f32 0.4, %v430_v56  ;;  %vm640_vm7 = vcmp.ge.f32.partialorder %v430_v56, 0.0  ;;  %v608_v49 = vmul.f32 0.4, %v237_v48 }
  0xc9   :  { %vm592_vm8 = vcmp.ge.f32.partialorder %v237_v48, 0.0 }
  0xca   :  { %v767_v47 = vadd.f32 %v751_v16, %v623_v30  ;;  %v672_v50 = vsel %vm640_vm7, %v430_v56, %v656_v46 }
  0xcc   :  { %v1655_v62 = vadd.f32 %v767_v47, %v555_v20  ;;  %v622_v47 = vsel %vm590_vm4, %v231_v39, %v606_v14 }
  0xcd   :  { %v715_v15 = vpop.permute.xlu1 %714  ;;  %v239_v45 = vpop.f32.mrf.mxu0 }
  0xce   :  { %v240_v35 = vadd.f32 %v239_v45, %v112_v8  ;;  %v432_v40 = vpop.f32.mrf.mxu1  ;;  %v624_v8 = vsel %vm592_vm8, %v237_v48, %v608_v49 }
  0xcf   :  { %v433_v51 = vadd.f32 %v432_v40, %v313_v59  ;;  %v558_v61 = vpop.f32.mrf.mxu2  ;;  %v703_v38 = vpop.permute.xlu2 %702 }
  0xd0   :  { %v750_v16 = vmul.f32 %v703_v38, %v670_v36  ;;  %v609_v30 = vmul.f32 0.4, %v240_v35  ;;  %vm593_vm6 = vcmp.ge.f32.partialorder %v240_v35, 0.0  ;;  %v1665_v26 = vpop.permute.xlu0 %718 }
  0xd1   :  { %vm641_vm5 = vcmp.ge.f32.partialorder %v433_v51, 0.0  ;;  %v657_v34 = vmul.f32 0.4, %v433_v51 }
  0xd2   :  { %v766_v20 = vadd.f32 %v750_v16, %v622_v47  ;;  %v625_v0 = vsel %vm593_vm6, %v240_v35, %v609_v30 }
  0xd3   :  { %v673_v11 = vsel %vm641_vm5, %v433_v51, %v657_v34 }
  0xd4   :  { %v753_v45 = vmul.f32 %v715_v15, %v673_v11  ;;  %v1659_v43 = vadd.f32 %v766_v20, %v552_v23  ;;  %v228_v23 = vadd.f32 %v1643_v53, %v92_v13 }
  0xd5   :  { %v711_v40 = vpop.permute.xlu1 %710  ;;  %v1661_v29 = vpop.f32.mrf.mxu0 }
  0xd6   :  { %v752_v59 = vmul.f32 %v711_v40, %v672_v50  ;;  %v435_v38 = vpop.f32.mrf.mxu1  ;;  %v769_v60 = vadd.f32 %v753_v45, %v625_v0  ;;  %v605_v46 = vmul.f32 0.4, %v228_v23  ;;  %vm589_vm10 = vcmp.ge.f32.partialorder %v228_v23, 0.0 }
  0xd7   :  { %v561_v2 = vpop.f32.mrf.mxu2 }
  0xd8   :  { %v768_v39 = vadd.f32 %v752_v59, %v624_v8  ;;  %v1663_v22 = vadd.f32 %v769_v60, %v561_v2  ;;  %v699_v16 = vpop.permute.xlu0 %698  ;;  %v621_v20 = vsel %vm589_vm10, %v228_v23, %v605_v46  ;;  %v1688_v8 = vpop.permute.xlu2 %288  ;;  %v1176_v46 = vmov 3  }
  0xd9   :  { %1144 = vset.pattern.permute.xlu0 %v1176_v46  ;;  %1145 = vset.pattern.permute.xlu1 %v1176_v46 }
  0xda   :  { %v1667_v14 = vadd.f32 %v768_v39, %v558_v61  ;;  %870 = vperm.xlu0 %1144, %v1231_v1   ;;  %866 = vperm.xlu1 %1145, %v1238_v3  }
  0xdb   :  { %1146 = vset.pattern.permute.xlu2 %v1176_v46 }
  0xdc   :  { %862 = vperm.xlu2 %1146, %v1243_v4  }
  0xdd   :  { %v245_v15 = vpop.f32.mrf.mxu0 }
  0xde   :  { %v438_v51 = vpop.f32.mrf.mxu1  ;;  %v1711_v3 = vadd.f32 %v245_v15, %v1593_v27 }
  0xdf   :  { %v297_v56 = vpop.permute.xlu1 %296  ;;  %v1670_v36 = vpop.f32.mrf.mxu2 }
  0xe0   :  { %v421_v35 = vadd.f32 %v1645_v55, %v297_v56  ;;  %v1694_v56 = vadd.f32 %v435_v38, %v1641_v52  ;;  %vm595_vm7 = vcmp.ge.f32.partialorder %v1711_v3, 0.0 }
  0xe2   :  { %vm637_vm9 = vcmp.ge.f32.partialorder %v421_v35, 0.0  ;;  %v653_v48 = vmul.f32 0.4, %v421_v35  ;;  %vm642_vm12 = vcmp.ge.f32.partialorder %v1694_v56, 0.0  ;;  %850 = vperm.xlu0 %1144, %v1264_v9   ;;  %858 = vperm.xlu1 %1145, %v1294_v17  }
  0xe4   :  { %v669_v30 = vsel %vm637_vm9, %v421_v35, %v653_v48  ;;  %v439_v48 = vadd.f32 %v438_v51, %v1626_v41  ;;  %v1707_v41 = vpop.permute.xlu2 %284  ;;  %854 = vperm.xlu2 %1146, %v1315_v21  }
  0xe5   :  { %v1673_v34 = vpop.f32.mrf.mxu0  ;;  %v749_v47 = vmul.f32 %v699_v16, %v669_v30 }
  0xe6   :  { %v441_v61 = vpop.f32.mrf.mxu1  ;;  %vm643_vm3 = vcmp.ge.f32.partialorder %v439_v48, 0.0 }
  0xe7   :  { %v1675_v49 = vpop.f32.mrf.mxu2  ;;  %v765_v13 = vadd.f32 %v749_v47, %v621_v20  ;;  %v1680_v55 = vpop.permute.xlu1 %292  ;;  %v442_v52 = vadd.f32 %v441_v61, %v1545_v12 }
  0xe9   :  { %v1678_v53 = vadd.f32 %v765_v13, %v1651_v5  ;;  %vm644_vm0 = vcmp.ge.f32.partialorder %v442_v52, 0.0 }
  0xea   :  { %838 = vperm.xlu0 %1144, %v1425_v42   ;;  %846 = vperm.xlu1 %1145, %v1335_v25   ;;  %v1905_v42 = vld [vmem:[#allocation23_spill] sm:$0xff] }
  0xed   :  { %v251_v11 = vpop.f32.mrf.mxu0 }
  0xee   :  { %v444_v45 = vpop.f32.mrf.mxu1 }
  0xef   :  { %v1682_v40 = vpop.f32.mrf.mxu2  ;;  %v445_v16 = vadd.f32 %v444_v45, %v1522_v63  ;;  %v659_v63 = vmul.f32 0.4, %v439_v48  ;;  %v660_v45 = vmul.f32 0.4, %v442_v52 }
  0xf0   :  { %v1686_v60 = vpop.permute.xlu1 %86 }
  0xf1   :  { %vm645_vm14 = vcmp.ge.f32.partialorder %v445_v16, 0.0 }
  0xf5   :  { %v254_v50 = vpop.f32.mrf.mxu0 }
  0xf6   :  { %v447_v0 = vpop.f32.mrf.mxu1  ;;  %v255_v61 = vadd.f32 %v254_v50, %v1588_v24  ;;  %v249_v24 = vadd.f32 %v1673_v34, %v1570_v19 }
  0xf7   :  { %v1684_v59 = vpop.f32.mrf.mxu2  ;;  %v448_v35 = vadd.f32 %v447_v0, %v1483_v54  ;;  %v658_v54 = vmul.f32 0.4, %v1694_v56  ;;  %v252_v0 = vadd.f32 %v251_v11, %v1604_v31 }
  0xf8   :  { %v1701_v30 = vpop.permute.xlu1 %81  ;;  %v614_v31 = vmul.f32 0.4, %v255_v61  ;;  %vm598_vm4 = vcmp.ge.f32.partialorder %v255_v61, 0.0  ;;  %vm596_vm6 = vcmp.ge.f32.partialorder %v249_v24, 0.0 }
  0xf9   :  { %v662_v1 = vmul.f32 0.4, %v448_v35  ;;  %vm646_vm13 = vcmp.ge.f32.partialorder %v448_v35, 0.0  ;;  %vm597_vm5 = vcmp.ge.f32.partialorder %v252_v0, 0.0 }
  0xfa   :  { %v630_v21 = vsel %vm598_vm4, %v255_v61, %v614_v31  ;;  %v1909_v31 = vld [vmem:[#allocation7_spill] sm:$0xff] }
  0xfb   :  { %826 = vperm.xlu0 %1144, %v1909_v31   ;;  %v808_v31 = vld [vmem:[%s1871_s4 + $0x78] sm:$0xff] }
  0xfd   :  { %v257_v2 = vpop.f32.mrf.mxu0 }
  0xfe   :  { %v450_v39 = vpop.f32.mrf.mxu1  ;;  %v258_v38 = vadd.f32 %v257_v2, %v1565_v18  ;;  %v661_v18 = vmul.f32 0.4, %v445_v16 }
  0xff   :  { %v451_v23 = vadd.f32 %v450_v39, %v1538_v7  ;;  %v1691_v5 = vpop.f32.mrf.mxu2  ;;  %v678_v39 = vsel %vm646_vm13, %v448_v35, %v662_v1  ;;  %v676_v35 = vsel %vm644_vm0, %v442_v52, %v660_v45  ;;  %v77_v1 = vpop.permute.xlu2 %76 }
 0x100   :  { %v615_v2 = vmul.f32 0.4, %v258_v38  ;;  %vm599_vm1 = vcmp.ge.f32.partialorder %v258_v38, 0.0  ;;  %v758_v50 = vmul.f32 %v1618_v10, %v678_v39  ;;  %v243_v10 = vadd.f32 %v1661_v29, %v1653_v6 }
 0x101   :  { %v663_v7 = vmul.f32 0.4, %v451_v23  ;;  %vm647_vm11 = vcmp.ge.f32.partialorder %v451_v23, 0.0  ;;  %v1725_v46 = vpop.permute.xlu1 %694 }
 0x102   :  { %v631_v9 = vsel %vm599_vm1, %v258_v38, %v615_v2  ;;  %v774_v38 = vadd.f32 %v758_v50, %v630_v21  ;;  %vm594_vm8 = vcmp.ge.f32.partialorder %v243_v10, 0.0  ;;  %v1906_v2 = vld [vmem:[#allocation20_spill] sm:$0xff] }
 0x103   :  { %v679_v4 = vsel %vm647_vm11, %v451_v23, %v663_v7  ;;  %v675_v7 = vsel %vm643_vm3, %v439_v48, %v659_v63  ;;  %v610_v63 = vmul.f32 0.4, %v243_v10 }
 0x104   :  { %v755_v6 = vmul.f32 %v1620_v37, %v675_v7  ;;  %v790_v61 = vadd.f32 %v774_v38, %v1691_v5  ;;  %v1917_v38 = vld [vmem:[#allocation11_spill] sm:$0xff] }
 0x105   :  { %v260_v51 = vpop.f32.mrf.mxu0  ;;  %v626_v25 = vsel %vm594_vm8, %v243_v10, %v610_v63 }
 0x106   :  { %v261_v12 = vadd.f32 %v260_v51, %v1649_v57  ;;  %v453_v47 = vpop.f32.mrf.mxu1  ;;  %v759_v57 = vmul.f32 %v1657_v28, %v679_v4  ;;  %v613_v28 = vmul.f32 0.4, %v252_v0  ;;  %v756_v51 = vmul.f32 %v1608_v33, %v676_v35  ;;  %v1904_v4 = vld [vmem:[#allocation8_spill] sm:$0xff] }
 0x107   :  { %v454_v20 = vadd.f32 %v453_v47, %v1606_v32  ;;  %v579_v13 = vpop.f32.mrf.mxu2  ;;  %v677_v32 = vsel %vm645_vm14, %v445_v16, %v661_v18  ;;  %842 = vperm.xlu2 %1146, %v1904_v4   ;;  %v72_v39 = vpop.permute.xlu2 %71 }
 0x108   :  { %v616_v27 = vmul.f32 0.4, %v261_v12  ;;  %vm600_vm2 = vcmp.ge.f32.partialorder %v261_v12, 0.0  ;;  %v757_v19 = vmul.f32 %v1633_v44, %v677_v32  ;;  %v775_v34 = vadd.f32 %v759_v57, %v631_v9 }
 0x109   :  { %vm648_vm15 = vcmp.ge.f32.partialorder %v454_v20, 0.0  ;;  %v664_v15 = vmul.f32 0.4, %v454_v20  ;;  %v674_v44 = vsel %vm642_vm12, %v1694_v56, %v658_v54  ;;  %v629_v18 = vsel %vm597_vm5, %v252_v0, %v613_v28  ;;  %v691_v45 = vpop.permute.xlu1 %690  ;;  %v1914_v28 = vld [vmem:[#allocation16_spill] sm:$0xff] }
 0x10a   :  { %v632_v17 = vsel %vm600_vm2, %v261_v12, %v616_v27  ;;  %v611_v12 = vmul.f32 0.4, %v1711_v3  ;;  %v773_v29 = vadd.f32 %v757_v19, %v629_v18  ;;  %v791_v48 = vadd.f32 %v775_v34, %v579_v13  ;;  %v281_v27 = vpop.permute.xlu0 %280 }
 0x10b   :  { %v680_v11 = vsel %vm648_vm15, %v454_v20, %v664_v15  ;;  %v754_v56 = vmul.f32 %v1665_v26, %v674_v44  ;;  %v418_v26 = vadd.f32 %v1905_v42, %v1680_v55  ;;  %v1908_v55 = vld [vmem:[#allocation22_spill] sm:$0xff]  ;;  %v219_v9 = vadd.f32 %v1914_v28, %v77_v1 }
 0x10c   :  { %v760_v23 = vmul.f32 %v1501_v58, %v680_v11  ;;  %v612_v58 = vmul.f32 0.4, %v249_v24  ;;  %v627_v37 = vsel %vm595_vm7, %v1711_v3, %v611_v12  ;;  %v789_v13 = vadd.f32 %v773_v29, %v1684_v59  ;;  %v1907_v59 = vld [vmem:[#allocation17_spill] sm:$0xff] }
 0x10d   :  { %v771_v20 = vadd.f32 %v755_v6, %v627_v37  ;;  %v770_v0 = vadd.f32 %v754_v56, %v626_v25  ;;  %v415_v3 = vadd.f32 %v1906_v2, %v1688_v8  ;;  %v412_v57 = vadd.f32 %v1907_v59, %v1707_v41  ;;  %v1911_v8 = vld [vmem:[#allocation15_spill] sm:$0xff]  ;;  %v1913_v41 = vld [vmem:[#allocation6_spill] sm:$0xff]  ;;  %v1918_v6 = vld [vmem:[#allocation12_spill] sm:$0xff] }
 0x10e   :  { %v776_v16 = vadd.f32 %v760_v23, %v632_v17  ;;  %v628_v33 = vsel %vm596_vm6, %v249_v24, %v612_v58  ;;  %v652_v24 = vmul.f32 0.4, %v418_v26  ;;  %v225_v32 = vadd.f32 %v1908_v55, %v1686_v60  ;;  %v1912_v23 = vld [vmem:[#allocation19_spill] sm:$0xff]  ;;  %v1920_v37 = vld [vmem:[#allocation24_spill] sm:$0xff]  ;;  %v1923_v25 = vld [vmem:[#allocation18_spill] sm:$0xff] }
 0x10f   :  { %v582_v52 = vpop.f32.mrf.mxu2  ;;  %v772_v54 = vadd.f32 %v756_v51, %v628_v33  ;;  %v787_v15 = vadd.f32 %v771_v20, %v1675_v49  ;;  %v786_v11 = vadd.f32 %v770_v0, %v1670_v36  ;;  %vm636_vm9 = vcmp.ge.f32.partialorder %v418_v26, 0.0  ;;  %830 = vperm.xlu2 %1146, %v1913_v41   ;;  %v1921_v20 = vld [vmem:[#allocation9_spill] sm:$0xff]  ;;  %v797_v0 = vld [vmem:[%s1871_s4 + $0x20] sm:$0xff]  ;;  %v799_v2 = vld [vmem:[%s1871_s4 + $0x30] sm:$0xff] }
 0x110   :  { %v792_v47 = vadd.f32 %v776_v16, %v582_v52  ;;  %v409_v49 = vadd.f32 %v1911_v8, %v281_v27  ;;  %v651_v50 = vmul.f32 0.4, %v415_v3  ;;  %v222_v35 = vadd.f32 %v1912_v23, %v1701_v30  ;;  %v1915_v30 = vld [vmem:[#allocation14_spill] sm:$0xff]  ;;  %v802_v27 = vld [vmem:[%s1871_s4 + $0x48] sm:$0xff]  ;;  %v793_v59 = vld [vmem:[%s1871_s4] sm:$0xff] }
 0x111   :  { %v788_v5 = vadd.f32 %v772_v54, %v1682_v40  ;;  %v1910_v40 = vld [vmem:[#allocation10_spill] sm:$0xff]  ;;  %vm635_vm10 = vcmp.ge.f32.partialorder %v415_v3, 0.0  ;;  %v650_v60 = vmul.f32 0.4, %v412_v57  ;;  %v604_v17 = vmul.f32 0.4, %v225_v32  ;;  %v687_v58 = vpop.permute.xlu1 %686 }
 0x112   :  { %873 = vmatpush.msrb.mxu1 %v792_v47  ;;  %1081 = vmatpush.msra.mxu3 %v792_v47  ;;  %v668_v19 = vsel %vm636_vm9, %v418_v26, %v652_v24  ;;  %vm588_vm11 = vcmp.ge.f32.partialorder %v225_v32, 0.0  ;;  %vm634_vm12 = vcmp.ge.f32.partialorder %v412_v57, 0.0  ;;  %v649_v34 = vmul.f32 0.4, %v409_v49  ;;  %v795_v26 = vld [vmem:[%s1871_s4 + $0x10] sm:$0xff]  ;;  %v805_v24 = vld [vmem:[%s1871_s4 + $0x60] sm:$0xff] }
 0x113   :  { %834 = vperm.xlu1 %1145, %v1910_v40   ;;  %v748_v36 = vmul.f32 %v1725_v46, %v668_v19  ;;  %v216_v16 = vadd.f32 %v1915_v30, %v72_v39  ;;  %v603_v10 = vmul.f32 0.4, %v222_v35  ;;  %v667_v7 = vsel %vm635_vm10, %v415_v3, %v651_v50  ;;  %v683_v46 = vpop.permute.xlu2 %682  ;;  %v800_v3 = vld [vmem:[%s1871_s4 + $0x38] sm:$0xff]  ;;  %v801_v39 = vld [vmem:[%s1871_s4 + $0x40] sm:$0xff]  ;;  %v806_v55 = vld [vmem:[%s1871_s4 + $0x68] sm:$0xff] }
 0x114   :  { %874 = vmatpush.msrb.mxu1 %v791_v48  ;;  %1082 = vmatpush.msra.mxu3 %v791_v48  ;;  %vm587_vm13 = vcmp.ge.f32.partialorder %v222_v35, 0.0  ;;  %vm633_vm14 = vcmp.ge.f32.partialorder %v409_v49, 0.0  ;;  %v747_v21 = vmul.f32 %v691_v45, %v667_v7  ;;  %v602_v1 = vmul.f32 0.4, %v219_v9  ;;  %v796_v45 = vld [vmem:[%s1871_s4 + $0x18] sm:$0xff] }
 0x115   :  { %v620_v52 = vsel %vm588_vm11, %v225_v32, %v604_v17  ;;  %v666_v51 = vsel %vm634_vm12, %v412_v57, %v650_v60  ;;  %vm586_vm15 = vcmp.ge.f32.partialorder %v219_v9, 0.0  ;;  %v601_v12 = vmul.f32 0.4, %v216_v16  ;;  %v804_v57 = vld [vmem:[%s1871_s4 + $0x58] sm:$0xff]  ;;  %v807_v32 = vld [vmem:[%s1871_s4 + $0x70] sm:$0xff] }
 0x116   :  { %875 = vmatpush.msrb.mxu1 %v790_v61  ;;  %1083 = vmatpush.msra.mxu3 %v790_v61  ;;  %v764_v47 = vadd.f32 %v748_v36, %v620_v52  ;;  %v746_v44 = vmul.f32 %v687_v58, %v666_v51  ;;  %v619_v18 = vsel %vm587_vm13, %v222_v35, %v603_v10  ;;  %vm585_vm0 = vcmp.ge.f32.partialorder %v216_v16, 0.0 }
 0x117   :  { %818 = vperm.xlu2 %1146, %v1918_v6   ;;  %v763_v48 = vadd.f32 %v747_v21, %v619_v18  ;;  %v618_v63 = vsel %vm586_vm15, %v219_v9, %v602_v1  ;;  %v617_v54 = vsel %vm585_vm0, %v216_v16, %v601_v12 }
 0x118   :  { %876 = vmatpush.msrb.mxu1 %v789_v13  ;;  %1084 = vmatpush.msra.mxu3 %v789_v13  ;;  %v762_v33 = vadd.f32 %v746_v44, %v618_v63  ;;  %v1922_v13 = vld [vmem:[#allocation21_spill] sm:$0xff] }
 0x119   :  { %v779_v4 = vadd.f32 %v763_v48, %v1920_v37 }
 0x11a   :  { %877 = vmatpush.msrb.mxu1 %v788_v5  ;;  %1085 = vmatpush.msra.mxu3 %v788_v5  ;;  %v798_v5 = vld [vmem:[%s1871_s4 + $0x28] sm:$0xff] }
 0x11b   :  { %822 = vperm.xlu1 %1145, %v1917_v38  }
 0x11c   :  { %878 = vmatpush.msrb.mxu1 %v787_v15  ;;  %1086 = vmatpush.msra.mxu3 %v787_v15  ;;  %v803_v15 = vld [vmem:[%s1871_s4 + $0x50] sm:$0xff] }
 0x11e   :  { %879 = vmatpush.msrb.mxu1 %v786_v11  ;;  %1087 = vmatpush.msra.mxu3 %v786_v11 }
 0x120   :  { %880 = vmatpush.msrb.mxu1 %v1663_v22  ;;  %1088 = vmatpush.msra.mxu3 %v1663_v22  ;;  %v1916_v22 = vld [vmem:[#allocation13_spill] sm:$0xff] }
 0x121   :  { %814 = vperm.xlu0 %1144, %v1916_v22  }
 0x122   :  { %881 = vmatpush.msrb.mxu1 %v1667_v14  ;;  %1089 = vmatpush.msra.mxu3 %v1667_v14  ;;  %v665_v14 = vsel %vm633_vm14, %v409_v49, %v649_v34 }
 0x123   :  { %v745_v29 = vmul.f32 %v683_v46, %v665_v14  ;;  %810 = vperm.xlu1 %1145, %v1921_v20  }
 0x124   :  { %882 = vmatpush.msrb.mxu1 %v1655_v62  ;;  %1090 = vmatpush.msra.mxu3 %v1655_v62  ;;  %v1919_v62 = vld [vmem:[#allocation25_spill] sm:$0xff] }
 0x125   :  { %v780_v56 = vadd.f32 %v764_v47, %v1919_v62  ;;  %v761_v61 = vadd.f32 %v745_v29, %v617_v54 }
 0x126   :  { %883 = vmatpush.msrb.mxu1 %v1659_v43  ;;  %1091 = vmatpush.msra.mxu3 %v1659_v43  ;;  %v778_v43 = vadd.f32 %v762_v33, %v1922_v13 }
 0x127   :  { %v777_v42 = vadd.f32 %v761_v61, %v1923_v25 }
 0x128   :  { %884 = vmatpush.msrb.mxu1 %v1678_v53  ;;  %1092 = vmatpush.msra.mxu3 %v1678_v53  ;;  %v794_v53 = vld [vmem:[%s1871_s4 + $0x8] sm:$0xff] }
 0x12a   :  { %885 = vmatpush.msrb.mxu1 %v780_v56  ;;  %1093 = vmatpush.msra.mxu3 %v780_v56 }
 0x12c   :  { %886 = vmatpush.msrb.mxu1 %v779_v4  ;;  %1094 = vmatpush.msra.mxu3 %v779_v4 }
 0x12e   :  { %887 = vmatpush.msrb.mxu1 %v778_v43  ;;  %1095 = vmatpush.msra.mxu3 %v778_v43 }
 0x130   :  { %888 = vmatpush.msrb.mxu1 %v777_v42  ;;  %1096 = vmatpush.msra.mxu3 %v777_v42 }
 0x131   :  { %892 = vmatmul.f32.vlgmr.msra.gmra.mxu3 %v794_v53  ;;  %889 = vmatmul.f32.vlgmr.msrb.gmra.mxu1 %v793_v59 }
 0x136   :  { %v863_v36 = vpop.permute.xlu2 %862 }
 0x139   :  { %895 = vmatmul.f32.gmra.mxu3 %v795_v26 }
 0x13e   :  { %v855_v10 = vpop.permute.xlu2 %854 }
 0x141   :  { %898 = vmatmul.f32.gmra.mxu3 %v796_v45 }
 0x149   :  { %901 = vmatmul.f32.gmra.mxu3 %v797_v0 }
 0x14c   :  { %v867_v17 = vpop.permute.xlu1 %866  ;;  %v871_v34 = vpop.permute.xlu0 %870 }
 0x151   :  { %904 = vmatmul.f32.gmra.mxu3 %v798_v5 }
 0x154   :  { %v859_v16 = vpop.permute.xlu1 %858  ;;  %v851_v7 = vpop.permute.xlu0 %850 }
 0x159   :  { %907 = vmatmul.f32.gmra.mxu3 %v799_v2 }
 0x15c   :  { %v847_v21 = vpop.permute.xlu1 %846  ;;  %v839_v38 = vpop.permute.xlu0 %838 }
 0x161   :  { %910 = vmatmul.f32.gmra.mxu3 %v800_v3  ;;  %v843_v46 = vpop.permute.xlu2 %842 }
 0x169   :  { %913 = vmatmul.f32.gmra.mxu3 %v801_v39  ;;  %v831_v61 = vpop.permute.xlu2 %830 }
 0x16d   :  { %v827_v13 = vpop.permute.xlu0 %826 }
 0x171   :  { %916 = vmatmul.f32.gmra.mxu3 %v802_v27  ;;  %v819_v59 = vpop.permute.xlu2 %818 }
 0x179   :  { %919 = vmatmul.f32.gmra.mxu3 %v803_v15 }
 0x181   :  { %922 = vmatmul.f32.gmra.mxu3 %v804_v57 }
 0x185   :  { %v835_v29 = vpop.permute.xlu1 %834 }
 0x189   :  { %925 = vmatmul.f32.gmra.mxu3 %v805_v24 }
 0x18d   :  { %v823_v0 = vpop.permute.xlu1 %822 }
 0x191   :  { %928 = vmatmul.f32.gmra.mxu3 %v806_v55 }
 0x199   :  { %931 = vmatmul.f32.gmra.mxu3 %v807_v32  ;;  %v815_v32 = vpop.permute.xlu0 %814 }
 0x1a1   :  { %934 = vmatmul.f32.gmra.mxu3 %v808_v31 }
 0x1b4   :  { %v1840_v40 = vpop.f32.mrf.mxu3 }
 0x1bc   :  { %v1842_v11 = vpop.f32.mrf.mxu3 }
 0x1bd   :  { %v897_v31 = vadd.f32 %v1842_v11, %v819_v59 }
 0x1bf   :  { %vm940_vm14 = vcmp.ge.f32.partialorder %v897_v31, 0.0 }
 0x1c4   :  { %v1844_v8 = vpop.f32.mrf.mxu3 }
 0x1c5   :  { %v900_v57 = vadd.f32 %v1844_v8, %v823_v0 }
 0x1c7   :  { %vm941_vm13 = vcmp.ge.f32.partialorder %v900_v57, 0.0 }
 0x1cc   :  { %v1846_v49 = vpop.f32.mrf.mxu3 }
 0x1cd   :  { %v903_v39 = vadd.f32 %v1846_v49, %v827_v13  ;;  %v890_v49 = vpop.f32.mrf.mxu1 }
 0x1cf   :  { %vm942_vm12 = vcmp.ge.f32.partialorder %v903_v39, 0.0 }
 0x1d4   :  { %v1848_v50 = vpop.f32.mrf.mxu3 }
 0x1d5   :  { %v906_v5 = vadd.f32 %v1848_v50, %v831_v61 }
 0x1d7   :  { %v959_v55 = vmul.f32 0.4, %v906_v5  ;;  %vm943_vm11 = vcmp.ge.f32.partialorder %v906_v5, 0.0 }
 0x1dc   :  { %v908_v23 = vpop.f32.mrf.mxu3 }
 0x1dd   :  { %v909_v53 = vadd.f32 %v908_v23, %v835_v29  ;;  %v958_v23 = vmul.f32 0.4, %v903_v39 }
 0x1df   :  { %v960_v15 = vmul.f32 0.4, %v909_v53  ;;  %vm944_vm10 = vcmp.ge.f32.partialorder %v909_v53, 0.0 }
 0x1e1   :  { %v976_v50 = vsel %vm944_vm10, %v909_v53, %v960_v15 }
 0x1e4   :  { %v911_v35 = vpop.f32.mrf.mxu3 }
 0x1e5   :  { %v912_v43 = vadd.f32 %v911_v35, %v839_v38  ;;  %v811_v35 = vpop.permute.xlu1 %810 }
 0x1e6   :  { %v891_v8 = vadd.f32 %v890_v49, %v811_v35 }
 0x1e7   :  { %v961_v3 = vmul.f32 0.4, %v912_v43  ;;  %vm945_vm9 = vcmp.ge.f32.partialorder %v912_v43, 0.0 }
 0x1e8   :  { %vm938_vm0 = vcmp.ge.f32.partialorder %v891_v8, 0.0 }
 0x1e9   :  { %v977_v24 = vsel %vm945_vm9, %v912_v43, %v961_v3 }
 0x1ec   :  { %v914_v41 = vpop.f32.mrf.mxu3 }
 0x1ed   :  { %v915_v37 = vadd.f32 %v914_v41, %v843_v46  ;;  %v894_v41 = vadd.f32 %v1840_v40, %v815_v32 }
 0x1ef   :  { %v962_v45 = vmul.f32 0.4, %v915_v37  ;;  %vm946_vm8 = vcmp.ge.f32.partialorder %v915_v37, 0.0  ;;  %vm939_vm15 = vcmp.ge.f32.partialorder %v894_v41, 0.0 }
 0x1f1   :  { %v978_v27 = vsel %vm946_vm8, %v915_v37, %v962_v45 }
 0x1f4   :  { %v917_v60 = vpop.f32.mrf.mxu3 }
 0x1f5   :  { %v918_v62 = vadd.f32 %v917_v60, %v847_v21  ;;  %v975_v60 = vsel %vm943_vm11, %v906_v5, %v959_v55 }
 0x1f7   :  { %v963_v42 = vmul.f32 0.4, %v918_v62  ;;  %vm947_vm7 = vcmp.ge.f32.partialorder %v918_v62, 0.0 }
 0x1f9   :  { %v979_v2 = vsel %vm947_vm7, %v918_v62, %v963_v42 }
 0x1fc   :  { %v920_v28 = vpop.f32.mrf.mxu3 }
 0x1fd   :  { %v921_v48 = vadd.f32 %v920_v28, %v851_v7  ;;  %v957_v28 = vmul.f32 0.4, %v900_v57  ;;  %v989_v7 = vstv %s1874_s7 }
 0x1ff   :  { %v964_v20 = vmul.f32 0.4, %v921_v48  ;;  %vm948_vm6 = vcmp.ge.f32.partialorder %v921_v48, 0.0  ;;  %v973_v11 = vsel %vm941_vm13, %v900_v57, %v957_v28 }
 0x201   :  { %v980_v26 = vsel %vm948_vm6, %v921_v48, %v964_v20 }
 0x204   :  { %v923_v9 = vpop.f32.mrf.mxu3 }
 0x205   :  { %v924_v14 = vadd.f32 %v923_v9, %v855_v10  ;;  %v974_v9 = vsel %vm942_vm12, %v903_v39, %v958_v23 }
 0x207   :  { %v965_v54 = vmul.f32 0.4, %v924_v14  ;;  %vm949_vm5 = vcmp.ge.f32.partialorder %v924_v14, 0.0 }
 0x209   :  { %v981_v25 = vsel %vm949_vm5, %v924_v14, %v965_v54 }
 0x20c   :  { %v926_v19 = vpop.f32.mrf.mxu3 }
 0x20d   :  { %v927_v47 = vadd.f32 %v926_v19, %v859_v16  ;;  %v955_v19 = vmul.f32 0.4, %v894_v41  ;;  %v986_v16 = vld [vmem:[%s1872_s5] sm:$0xff] }
 0x20f   :  { %v966_v33 = vmul.f32 0.4, %v927_v47  ;;  %vm950_vm4 = vcmp.ge.f32.partialorder %v927_v47, 0.0  ;;  %v971_v40 = vsel %vm939_vm15, %v894_v41, %v955_v19 }
 0x211   :  { %v982_v4 = vsel %vm950_vm4, %v927_v47, %v966_v33 }
 0x214   :  { %v929_v30 = vpop.f32.mrf.mxu3 }
 0x215   :  { %v930_v51 = vadd.f32 %v929_v30, %v863_v36  ;;  %v987_v30 = vld [vmem:[%s1872_s5 + $0x8] sm:$0xff]  ;;  %s1178_s5 = smov 128  }
 0x217   :  { %v967_v6 = vmul.f32 0.4, %v930_v51  ;;  %vm951_vm3 = vcmp.ge.f32.partialorder %v930_v51, 0.0 }
 0x219   :  { %v983_v56 = vsel %vm951_vm3, %v930_v51, %v967_v6 }
 0x21c   :  { %v932_v58 = vpop.f32.mrf.mxu3 }
 0x21d   :  { %v933_v1 = vadd.f32 %v932_v58, %v867_v17  ;;  %v956_v17 = vmul.f32 0.4, %v897_v31 }
 0x21f   :  { %v968_v12 = vmul.f32 0.4, %v933_v1  ;;  %vm952_vm2 = vcmp.ge.f32.partialorder %v933_v1, 0.0  ;;  %v972_v36 = vsel %vm940_vm14, %v897_v31, %v956_v17 }
 0x221   :  { %v984_v63 = vsel %vm952_vm2, %v933_v1, %v968_v12 }
 0x224   :  { %v935_v52 = vpop.f32.mrf.mxu3 }
 0x225   :  { %v936_v22 = vadd.f32 %v935_v52, %v871_v34  ;;  %v954_v34 = vmul.f32 0.4, %v891_v8 }
 0x227   :  { %vm953_vm1 = vcmp.ge.f32.partialorder %v936_v22, 0.0  ;;  %v969_v44 = vmul.f32 0.4, %v936_v22  ;;  %v970_v10 = vsel %vm938_vm0, %v891_v8, %v954_v34 }
 0x229   :  { %v985_v18 = vsel %vm953_vm1, %v936_v22, %v969_v44 }
 0x22a   :  { %990 = vmatpush.msrb.mxu0 %v985_v18  ;;  %1097 = vmatpush.msrb.mxu2 %v985_v18 }
 0x22c   :  { %991 = vmatpush.msrb.mxu0 %v984_v63  ;;  %1098 = vmatpush.msrb.mxu2 %v984_v63 }
 0x22e   :  { %992 = vmatpush.msrb.mxu0 %v983_v56  ;;  %1099 = vmatpush.msrb.mxu2 %v983_v56 }
 0x230   :  { %993 = vmatpush.msrb.mxu0 %v982_v4  ;;  %1100 = vmatpush.msrb.mxu2 %v982_v4 }
 0x232   :  { %994 = vmatpush.msrb.mxu0 %v981_v25  ;;  %1101 = vmatpush.msrb.mxu2 %v981_v25 }
 0x234   :  { %995 = vmatpush.msrb.mxu0 %v980_v26  ;;  %1102 = vmatpush.msrb.mxu2 %v980_v26 }
 0x236   :  { %996 = vmatpush.msrb.mxu0 %v979_v2  ;;  %1103 = vmatpush.msrb.mxu2 %v979_v2 }
 0x238   :  { %997 = vmatpush.msrb.mxu0 %v978_v27  ;;  %1104 = vmatpush.msrb.mxu2 %v978_v27 }
 0x23a   :  { %998 = vmatpush.msrb.mxu0 %v977_v24  ;;  %1105 = vmatpush.msrb.mxu2 %v977_v24 }
 0x23c   :  { %999 = vmatpush.msrb.mxu0 %v976_v50  ;;  %1106 = vmatpush.msrb.mxu2 %v976_v50 }
 0x23e   :  { %1000 = vmatpush.msrb.mxu0 %v975_v60  ;;  %1107 = vmatpush.msrb.mxu2 %v975_v60 }
 0x240   :  { %1001 = vmatpush.msrb.mxu0 %v974_v9  ;;  %1108 = vmatpush.msrb.mxu2 %v974_v9 }
 0x242   :  { %1002 = vmatpush.msrb.mxu0 %v973_v11  ;;  %1109 = vmatpush.msrb.mxu2 %v973_v11 }
 0x244   :  { %1003 = vmatpush.msrb.mxu0 %v972_v36  ;;  %1110 = vmatpush.msrb.mxu2 %v972_v36 }
 0x246   :  { %1004 = vmatpush.msrb.mxu0 %v971_v40  ;;  %1111 = vmatpush.msrb.mxu2 %v971_v40 }
 0x248   :  { %1005 = vmatpush.msrb.mxu0 %v970_v10  ;;  %1112 = vmatpush.msrb.mxu2 %v970_v10 }
 0x249   :  { %1009 = vmatmul.f32.vlgmr.msrb.gmra.mxu2 %v987_v30  ;;  %1006 = vmatmul.f32.vlgmr.msrb.gmra.mxu0 %v986_v16 }
 0x2c6   :  { %v1007_v58 = vpop.f32.mrf.mxu0 }
 0x2c7   :  { %v1008_v21 = vadd.f32 %v1007_v58, %v989_v7 }
 0x2c9   :  { %1013 = vst [vmem:[#allocation3] sm:$0xff] %v1008_v21 }
 0x2cc   :  { %v1010_v1 = vpop.f32.mrf.mxu2 }
 0x2cd   :  { %v1011_v46 = vadd.f32 %v1010_v1, %v989_v7 }
 0x2cf   :  { %1014 = vst [vmem:[#allocation3 + $0x8] sm:$0xff] %v1011_v46 }
 0x2d0   :  { %1027 = dma.vmem_to_hbm [thread:$0]  %s1020_s14, 256, %s1022_s17, [#allocation4], %s1178_s5, %s1178_s5, %s1179_s18  }
 0x2d1   :  { %1171 = dma.done.wait [#allocation4], 256  }
 0x2d2   :  { %1172 = vsyncadd [#allocation4], 4294967040 }
 0x2d3   :  { %1032 = vsyncpa [#allocation4], 1 }

</bundles_post_ra>
